<compile_context>
chip_gen: v7x
topology: tpu7x:2x2x1
jax: 0.10.0
libtpu: 0.0.40
codegen_flags: <defaults>
</compile_context>

<pallas_src>
import jax
import jax.numpy as jnp
from jax.experimental import pallas as pl
from jax.experimental.pallas import tpu as pltpu

TAU = 2.0
V_TH = 1.0
BN_EPS = 1e-5


def _pick_tile(dim, pref, step):
    """Largest tile <= pref (multiple of `step`) that divides dim, else dim."""
    if dim <= pref:
        return dim
    cand = (pref // step) * step
    while cand >= step:
        if dim % cand == 0:
            return cand
        cand -= step
    return dim


# --------- fused kernel: patch matmul + bias + BN affine + MultiStep LIF ---------
def patch_embed_kernel(p_ref, w_ref, b_ref, scale_ref, shift_ref, o_ref, v_ref):
    t = pl.program_id(2)

    # A new (l, c) feature tile starts its time sweep: reset the membrane.
    @pl.when(t == 0)
    def _():
        v_ref[...] = jnp.zeros_like(v_ref)

    # (tl, K) bf16 @ (K, tn) bf16 -> f32 on the MXU; weight stays VMEM-resident.
    y = jnp.dot(p_ref[0], w_ref[...], preferred_element_type=jnp.float32)
    y = y + b_ref[...]                          # conv bias   (1, tn)
    y = y * scale_ref[...] + shift_ref[...]     # BN affine   (tl, 1), per l row

    # LIF: charge / fire / hard reset, thresholding on the f32 value.
    v = v_ref[...]
    h = v + (y - v) * (1.0 / TAU)               # decay_input=True, v_reset=0
    spike = (h >= V_TH).astype(jnp.float32)
    v_ref[...] = h * (1.0 - spike)
    o_ref[0] = spike.astype(o_ref.dtype)


def patch_embed_forward(x, conv_w, conv_b, bn_gamma, bn_beta, bn_mean, bn_var,
                        patch_size, tubelet):
    B, Cin, T, H, W = x.shape
    p, kt = patch_size, tubelet
    Tp, Hp, Wp = T // kt, H // p, W // p
    C = conv_w.shape[0]
    K = Cin * kt * p * p
    L = Hp * Wp
    n_steps = B * Tp
    M = n_steps * L

    # ---- glue (XLA): non-overlapping (kt,p,p) tubelets -> (n_steps, L, K) bf16 ----
    # TODO(synk): fuse this gather into the kernel to remove its HBM round trip.
    xb = x.astype(jnp.bfloat16)
    patches = xb.reshape(B, Cin, Tp, kt, Hp, p, Wp, p)
    patches = patches.transpose(0, 2, 4, 6, 1, 3, 5, 7).reshape(n_steps, L, K)

    w_mat = conv_w.reshape(C, K).T.astype(jnp.bfloat16)          # (K, C), resident
    bias = conv_b.reshape(1, C).astype(jnp.float32)

    # Eval-mode BN (feature axis = the L spatial positions) -> per-l scale/shift.
    f32 = jnp.float32
    inv_std = 1.0 / jnp.sqrt(bn_var.astype(f32) + BN_EPS)
    scale_l = (bn_gamma.astype(f32) * inv_std).reshape(L, 1)
    shift_l = (bn_beta.astype(f32)
               - bn_mean.astype(f32) * bn_gamma.astype(f32) * inv_std).reshape(L, 1)

    # ---- tile picking ----
    # tn: full embed_dim when it fits; otherwise largest 128-multiple divisor.
    # (embed_dim in this module family, e.g. 768, is 128-aligned -> unmasked vst.)
    tn = _pick_tile(C, 768, 128)
    # tl: prefer >= 2 parallel l-tiles when L allows it (v7x two-TC sharding);
    # step 16 keeps bf16 sublane packing happy.
    if L >= 32:
        tl = _pick_tile(L, min(512, L // 2), 16)
    else:
        tl = L

    assert K * C * 2 <= 8 * 1024 * 1024, (
        "weight too large for VMEM residency; re-introduce a K grid axis")

    def _vmem_bytes(tl_, tn_):
        return (2 * tl_ * K * 2            # patch stream, bf16, double-buffered
                + 2 * K * tn_ * 2          # resident weight (double-buffered alloc)
                + 2 * tl_ * tn_ * 4        # f32 spike output stream
                + tl_ * tn_ * 4            # membrane scratch
                + 2 * 8 * tn_ * 4          # bias (sublane-padded)
                + 2 * 2 * tl_ * 128 * 4)   # scale/shift (lane-padded to 128)

    VMEM_BUDGET = 40 * 1024 * 1024         # headroom on v7x's 64 MiB VMEM
    while _vmem_bytes(tl, tn) > VMEM_BUDGET and tl > 16:
        new_tl = _pick_tile(L, max(16, tl // 2), 16)
        if new_tl >= tl:
            break
        tl = new_tl

    l_tiles = L // tl
    c_tiles = C // tn
    grid = (l_tiles, c_tiles, n_steps)

    vmem_limit = int(min(max(int(_vmem_bytes(tl, tn) * 1.5), 8 * 1024 * 1024),
                         48 * 1024 * 1024))

    cost = pl.CostEstimate(
        flops=2 * M * K * C,
        transcendentals=0,
        bytes_accessed=M * K * 2 + K * C * 2 + M * C * 4 + 2 * L * 4 + C * 4)

    out = pl.pallas_call(
        patch_embed_kernel,
        out_shape=jax.ShapeDtypeStruct((n_steps, L, C), jnp.float32),
        grid_spec=pltpu.PrefetchScalarGridSpec(
            num_scalar_prefetch=0,
            grid=grid,
            in_specs=[
                pl.BlockSpec((1, tl, K), lambda l, c, t: (t, l, 0)),   # patches
                pl.BlockSpec((K, tn), lambda l, c, t: (0, c)),         # weight
                pl.BlockSpec((1, tn), lambda l, c, t: (0, c)),         # conv bias
                pl.BlockSpec((tl, 1), lambda l, c, t: (l, 0)),         # BN scale
                pl.BlockSpec((tl, 1), lambda l, c, t: (l, 0)),         # BN shift
            ],
            out_specs=pl.BlockSpec((1, tl, tn), lambda l, c, t: (t, l, c)),
            scratch_shapes=[pltpu.VMEM((tl, tn), jnp.float32)]),       # membrane v
        compiler_params=pltpu.CompilerParams(
            dimension_semantics=("parallel", "parallel", "arbitrary"),
            vmem_limit_bytes=vmem_limit),
        cost_estimate=cost,
    )(patches, w_mat, bias, scale_l, shift_l)

    return out


# ---------------- pure-JAX reference (same math, for a sanity check) ----------------
def _reference(x, conv_w, conv_b, bn_gamma, bn_beta, bn_mean, bn_var, p, kt):
    B, Cin, T, H, W = x.shape
    Tp, Hp, Wp = T // kt, H // p, W // p
    C = conv_w.shape[0]
    K = Cin * kt * p * p
    L = Hp * Wp
    n_steps = B * Tp
    xb = x.astype(jnp.bfloat16)
    pat = xb.reshape(B, Cin, Tp, kt, Hp, p, Wp, p)
    pat = pat.transpose(0, 2, 4, 6, 1, 3, 5, 7).reshape(n_steps * L, K)
    wm = conv_w.reshape(C, K).T.astype(jnp.bfloat16)
    y = jnp.dot(pat, wm, preferred_element_type=jnp.float32) + conv_b[None, :]
    y = y.reshape(n_steps, L, C)
    inv_std = 1.0 / jnp.sqrt(bn_var + BN_EPS)
    y = ((y - bn_mean[None, :, None]) * (inv_std * bn_gamma)[None, :, None]
         + bn_beta[None, :, None])
    v = jnp.zeros((L, C), jnp.float32)
    outs = []
    for t in range(n_steps):
        h = v + (y[t] - v) / TAU
        s = (h >= V_TH).astype(jnp.float32)
        v = h * (1.0 - s)
        outs.append(s)
    return jnp.stack(outs, 0)


if __name__ == "__main__":
    key = jax.random.PRNGKey(0)
    # Small shapes consistent with the module: B=2, in_chans=3, num_frames=4,
    # img=32, patch=8, tubelet(kernel_size)=2, embed_dim=32 -> L=16, T'=2.
    B, Cin, T, H, W = 2, 3, 4, 32, 32
    patch, kt, C = 8, 2, 32
    L = (H // patch) * (W // patch)

    ks = jax.random.split(key, 7)
    x = jax.random.normal(ks[0], (B, Cin, T, H, W), jnp.float32)
    conv_w = jax.random.normal(ks[1], (C, Cin, kt, patch, patch), jnp.float32) * 0.05
    conv_b = jax.random.normal(ks[2], (C,), jnp.float32) * 0.1
    bn_gamma = 1.0 + 0.1 * jax.random.normal(ks[3], (L,), jnp.float32)
    bn_beta = 0.1 * jax.random.normal(ks[4], (L,), jnp.float32)
    bn_mean = 0.1 * jax.random.normal(ks[5], (L,), jnp.float32)
    bn_var = jnp.abs(jax.random.normal(ks[6], (L,), jnp.float32)) + 0.5

    fwd = jax.jit(patch_embed_forward, static_argnums=(7, 8))
    out = fwd(x, conv_w, conv_b, bn_gamma, bn_beta, bn_mean, bn_var, patch, kt)
    out = jax.block_until_ready(out)

    assert out.shape == (B * (T // kt), L, C), out.shape
    # LIF output must be binary spikes
    assert bool(jnp.all((out == 0.0) | (out == 1.0)))

    ref = _reference(x, conv_w, conv_b, bn_gamma, bn_beta, bn_mean, bn_var, patch, kt)
    mismatch = float(jnp.mean(jnp.abs(out - ref)))
    assert mismatch < 0.02, f"spike mismatch fraction too large: {mismatch}"

    print("KERNEL_OK")
</pallas_src>

<mosaic_0001>
module attributes {stable_mosaic.version = 11 : i64} {
  func.func @patch_embed_kernel(%arg0: i32, %arg1: i32, %arg2: i32, %arg3: memref<1x16x384xbf16, #tpu.memory_space<vmem>>, %arg4: memref<384x32xbf16, #tpu.memory_space<vmem>>, %arg5: memref<1x32xf32, #tpu.memory_space<vmem>>, %arg6: memref<16x1xf32, #tpu.memory_space<vmem>>, %arg7: memref<16x1xf32, #tpu.memory_space<vmem>>, %arg8: memref<1x16x32xf32, #tpu.memory_space<vmem>>, %arg9: memref<16x32xf32, #tpu.memory_space<vmem>>) attributes {dimension_semantics = [#tpu.dimension_semantics<parallel>, #tpu.dimension_semantics<parallel>, #tpu.dimension_semantics<arbitrary>], iteration_bounds = array<i64: 1, 1, 4>, scalar_prefetch = 0 : i64, scratch_operands = 1 : i64, tpu.core_type = #tpu.core_type<tc>, window_params = [{transform_indices = @transform_0, window_bounds = array<i64: 1, 16, 384>}, {transform_indices = @transform_1, window_bounds = array<i64: 384, 32>}, {transform_indices = @transform_2, window_bounds = array<i64: 1, 32>}, {transform_indices = @transform_3, window_bounds = array<i64: 16, 1>}, {transform_indices = @transform_4, window_bounds = array<i64: 16, 1>}, {transform_indices = @transform_5, window_bounds = array<i64: 1, 16, 32>}]} {
    %c0_i32 = arith.constant 0 : i32
    %0 = arith.cmpi eq, %arg2, %c0_i32 : i32
    %1 = arith.extui %0 : i1 to i32
    %c0_i32_0 = arith.constant 0 : i32
    %2 = arith.cmpi ne, %1, %c0_i32_0 : i32
    scf.if %2 {
      %cst_21 = arith.constant 0.000000e+00 : f32
      %32 = vector.broadcast %cst_21 : f32 to vector<16x32xf32>
      %c0_22 = arith.constant 0 : index
      %c0_23 = arith.constant 0 : index
      %33 = vector.load %arg9[%c0_22, %c0_23] : memref<16x32xf32, #tpu.memory_space<vmem>>, vector<16x32xf32>
      tpu.vector_store %arg9[%c0_22, %c0_23], %32 {strides = array<i32>} : memref<16x32xf32, #tpu.memory_space<vmem>>, vector<16x32xf32>,
    } else {
    }
    %c0 = arith.constant 0 : index
    %c0_1 = arith.constant 0 : index
    %c0_2 = arith.constant 0 : index
    %3 = vector.load %arg3[%c0, %c0_1, %c0_2] : memref<1x16x384xbf16, #tpu.memory_space<vmem>>, vector<1x16x384xbf16>
    %4 = vector.shape_cast %3 : vector<1x16x384xbf16> to vector<16x384xbf16>
    %c0_3 = arith.constant 0 : index
    %c0_4 = arith.constant 0 : index
    %5 = vector.load %arg4[%c0_3, %c0_4] : memref<384x32xbf16, #tpu.memory_space<vmem>>, vector<384x32xbf16>
    %cst = arith.constant dense<0.000000e+00> : vector<16x32xf32>
    %6 = tpu.matmul %4, %5, %cst {dimension_numbers = #tpu.dot_dimension_numbers<[1], [0], [0], [1], [0, 0, 1, 1], [], []>} : vector<16x384xbf16>, vector<384x32xbf16>, vector<16x32xf32> -> vector<16x32xf32>
    %c0_5 = arith.constant 0 : index
    %c0_6 = arith.constant 0 : index
    %7 = vector.load %arg5[%c0_5, %c0_6] : memref<1x32xf32, #tpu.memory_space<vmem>>, vector<1x32xf32>
    %8 = vector.broadcast %7 : vector<1x32xf32> to vector<16x32xf32>
    %9 = arith.addf %6, %8 : vector<16x32xf32>
    %c0_7 = arith.constant 0 : index
    %c0_8 = arith.constant 0 : index
    %10 = vector.load %arg6[%c0_7, %c0_8] : memref<16x1xf32, #tpu.memory_space<vmem>>, vector<16x1xf32>
    %11 = vector.broadcast %10 : vector<16x1xf32> to vector<16x32xf32>
    %12 = arith.mulf %9, %11 : vector<16x32xf32>
    %c0_9 = arith.constant 0 : index
    %c0_10 = arith.constant 0 : index
    %13 = vector.load %arg7[%c0_9, %c0_10] : memref<16x1xf32, #tpu.memory_space<vmem>>, vector<16x1xf32>
    %14 = vector.broadcast %13 : vector<16x1xf32> to vector<16x32xf32>
    %15 = arith.addf %12, %14 : vector<16x32xf32>
    %c0_11 = arith.constant 0 : index
    %c0_12 = arith.constant 0 : index
    %16 = vector.load %arg9[%c0_11, %c0_12] : memref<16x32xf32, #tpu.memory_space<vmem>>, vector<16x32xf32>
    %17 = arith.subf %15, %16 : vector<16x32xf32>
    %cst_13 = arith.constant 5.000000e-01 : f32
    %18 = vector.broadcast %cst_13 : f32 to vector<16x32xf32>
    %19 = arith.mulf %17, %18 : vector<16x32xf32>
    %20 = arith.addf %16, %19 : vector<16x32xf32>
    %cst_14 = arith.constant 1.000000e+00 : f32
    %21 = vector.broadcast %cst_14 : f32 to vector<16x32xf32>
    %22 = arith.cmpf oge, %20, %21 : vector<16x32xf32>
    %23 = arith.extui %22 : vector<16x32xi1> to vector<16x32xi32>
    %24 = arith.sitofp %23 : vector<16x32xi32> to vector<16x32xf32>
    %cst_15 = arith.constant 1.000000e+00 : f32
    %25 = vector.broadcast %cst_15 : f32 to vector<16x32xf32>
    %26 = arith.subf %25, %24 : vector<16x32xf32>
    %27 = arith.mulf %20, %26 : vector<16x32xf32>
    %c0_16 = arith.constant 0 : index
    %c0_17 = arith.constant 0 : index
    %28 = vector.load %arg9[%c0_16, %c0_17] : memref<16x32xf32, #tpu.memory_space<vmem>>, vector<16x32xf32>
    tpu.vector_store %arg9[%c0_16, %c0_17], %27 {strides = array<i32>} : memref<16x32xf32, #tpu.memory_space<vmem>>, vector<16x32xf32>,
    %c0_18 = arith.constant 0 : index
    %c0_19 = arith.constant 0 : index
    %c0_20 = arith.constant 0 : index
    %29 = vector.load %arg8[%c0_18, %c0_19, %c0_20] : memref<1x16x32xf32, #tpu.memory_space<vmem>>, vector<1x16x32xf32>
    %30 = vector.shape_cast %29 : vector<1x16x32xf32> to vector<16x32xf32>
    %31 = vector.shape_cast %24 : vector<16x32xf32> to vector<1x16x32xf32>
    tpu.vector_store %arg8[%c0_18, %c0_19, %c0_20], %31 {strides = array<i32>} : memref<1x16x32xf32, #tpu.memory_space<vmem>>, vector<1x16x32xf32>,
    return
  }
  func.func @transform_0(%arg0: i32, %arg1: i32, %arg2: i32) -> (i32, i32, i32) {
    %c0_i32 = arith.constant 0 : i32
    %c0_i32_0 = arith.constant 0 : i32
    return %arg2, %arg0, %c0_i32 : i32, i32, i32
  }
  func.func @transform_1(%arg0: i32, %arg1: i32, %arg2: i32) -> (i32, i32) {
    %c0_i32 = arith.constant 0 : i32
    %c0_i32_0 = arith.constant 0 : i32
    return %c0_i32, %arg1 : i32, i32
  }
  func.func @transform_2(%arg0: i32, %arg1: i32, %arg2: i32) -> (i32, i32) {
    %c0_i32 = arith.constant 0 : i32
    %c0_i32_0 = arith.constant 0 : i32
    return %c0_i32, %arg1 : i32, i32
  }
  func.func @transform_3(%arg0: i32, %arg1: i32, %arg2: i32) -> (i32, i32) {
    %c0_i32 = arith.constant 0 : i32
    %c0_i32_0 = arith.constant 0 : i32
    return %arg0, %c0_i32 : i32, i32
  }
  func.func @transform_4(%arg0: i32, %arg1: i32, %arg2: i32) -> (i32, i32) {
    %c0_i32 = arith.constant 0 : i32
    %c0_i32_0 = arith.constant 0 : i32
    return %arg0, %c0_i32 : i32, i32
  }
  func.func @transform_5(%arg0: i32, %arg1: i32, %arg2: i32) -> (i32, i32, i32) {
    %c0_i32 = arith.constant 0 : i32
    return %arg2, %arg0, %arg1 : i32, i32, i32
  }
}

</mosaic_0001>

<bundles_post_ra>
// kernel: patch_embed_forward.1
= control target key start
LH: loop header
LB: loop body
LE: loop exit
PB: predicated region body
PF: predicated region fallthrough
CT: control target
= control target key end

     0   :  { %10 = vsyncpa [#allocation4], 0  ;;  %s1401_s0 = inlined_call_operand.vmem [shape: bf16[4,16,384], index: 0, kind: input, shape index: {}]   ;;  %s1402_s1 = inlined_call_operand.vmem [shape: bf16[384,32], index: 1, kind: input, shape index: {}]   ;;  %s1403_s2 = inlined_call_operand.vmem [shape: f32[1,32], index: 2, kind: input, shape index: {}]   ;;  %s1404_s3 = inlined_call_operand.vmem [shape: f32[16,1], index: 3, kind: input, shape index: {}]   ;;  %s1405_s4 = inlined_call_operand.vmem [shape: f32[16,1], index: 4, kind: input, shape index: {}]   ;;  %s1406_s5 = inlined_call_operand.hbm [shape: f32[4,16,32], index: 5, kind: output, shape index: {}]  }
   0x1   :  { %12 = vsyncpa [#allocation4 + $0x1], 0  ;;  %s1169_s18 = smov 0   ;;  %s1171_s19 = smov 0  }
   0x2   :  { %s1173_s20 = smov 0   ;;  %s1175_s21 = smov 0  }
   0x3   :  { %s1177_s22 = smov 0   ;;  %s1179_s23 = smov 0  }
   0x4 LB: > { %s861_s24 = sadd.s32 4294967295, %s1130_s23   ;;  %s862_s25 = sadd.s32 4294967294, %s1130_s23   ;;  %s1130_s23 = sphi %s1179_s23, %s18_s23   ;;  %s1126_s22 = sphi %s1177_s22, %s1413_s22   ;;  %s1122_s21 = sphi %s1175_s21, %s1412_s21   ;;  %s1118_s20 = sphi %s1173_s20, %s1411_s20   ;;  %s1114_s19 = sphi %s1171_s19, %s1410_s19   ;;  %s1110_s18 = sphi %s1169_s18, %s1409_s18  }
   0x5   : > { %s30_s26 = sadd.s32 1, %s1126_s22  ;;  %s180_s27 = sadd.s32 1, %s1118_s20 }
   0x6   : > { %p31_p0 = scmp.ge.s32.totalorder %s30_s26, 4  ;;  %p190_p1 = scmp.ne.s32.totalorder %s1118_s20, %s1114_s19 }
   0x7   : > { %p191_p2 = scmp.eq.s32.totalorder %s861_s24, 3  ;;  %p196_p3 = scmp.ne.s32.totalorder %s1114_s19, %s1110_s18 }
   0x8   : > { %s1415_s26 = smov (%p31_p0, %s30_s26), 0  ;;  %p197_p5 = scmp.eq.s32.totalorder %s862_s25, 3 }
   0x9   : > { %p1209_p4 = por %p191_p2, %p190_p1  ;;  %s173_s29 = ssub.s32 %s1126_s22, %s1415_s26 }
   0xa   : > { %p869_p6 = scmp.ge.s32.totalorder %s1130_s23, 1  ;;  %p178_p7 = scmp.eq.s32.totalorder %s173_s29, 0 }
   0xb   : > { %p1216_p8 = por %p197_p5, %p196_p3  ;;  %p260_p9 = scmp.lt.s32.totalorder %s1130_s23, 5 }
   0xc   : > { %s1222_s6 = scalar_select %p178_p7, %s1118_s20, %s180_s27  }
   0xd   : > { %p261_p10 = pnand %p869_p6, %p260_p9 }
   0xe   : > { %s307_s7 = sand.u32 (!%p261_p10), 1, %s1114_s19   ;;  %p311_p11 = scmp.lt.s32.totalorder (!%p261_p10), %s1122_s21, 3 }
   0xf   : > { %264 = sbr.rel (%p261_p10) target bundleno = 312 (0x138), region = 40  ;;  %s870_s8 = sshll.u32 (!%p261_p10), %s307_s7, 4 }
  0x10   : > { %s1234_s14 = scalar_lea.vmem (!%p261_p10), [#allocation3], %s870_s8  ;;  %p872_p12 = scmp.ne.s32.totalorder (!%p261_p10), %s1122_s21, 0 }
  0x16   : > { %s312_s9 = scalar_select %p311_p11, %s1122_s21, 3 }
  0x17   : > { %345 = sbr.rel (%p872_p12) target bundleno = 30 (0x1e), region = 44  ;;  %vm346_vm0 = vcmask (!%p872_p12), 261120   ;;  %v1132_v0 = vmov (!%p872_p12), 0.0  }
  0x18   : > { %s960_s10 = smul.u32 24, %s312_s9  ;;  %347 = vst.msk [vmem:[#allocation2] sm:$0xff] (!%p872_p12), %vm346_vm0, %v1132_v0  ;;  %348 = vst.msk [vmem:[#allocation2 + $0x8] sm:$0xff] (!%p872_p12), %vm346_vm0, %v1132_v0 }
  0x1a   : > { %s1232_s13 = scalar_lea.vmem %s1401_s0, %s960_s10 }
  0x1e PF: > { %v1024_v1 = vld [vmem:[%s1402_s1 + $0x40] sm:$0xff]   ;;  %v1133_v3 = vmov 0.0   ;;  %vm1134_vm1 = vmmov 0   ;;  %v1027_v5 = vld [vmem:[%s1402_s1 + $0x48] sm:$0xff]   ;;  %v1135_v6 = vmov 0   ;;  %v1030_v9 = vld [vmem:[%s1402_s1 + $0x50] sm:$0xff]  }
  0x1f   : > { %v1025_v2 = vld [vmem:[%s1402_s1] sm:$0xff]   ;;  %940 = vmatprep.subr.bf16.mxu1 %v1133_v3  ;;  %909 = vmatprep.subr.bf16.mxu0 %v1024_v1  ;;  %v1028_v7 = vld [vmem:[%s1402_s1 + $0x8] sm:$0xff]   ;;  %v1031_v10 = vld [vmem:[%s1402_s1 + $0x10] sm:$0xff]   ;;  %s718_s11 = sshll.u32 %s1234_s14, 4  ;;  %vm696_vm2 = vcmask 261120   ;;  %s1136_s24 = smov [#allocation3]   ;;  %s1344_s11 = int_to_ptr.vmem [resolvable:$true] %s718_s11 }
  0x20   : > { %v1026_v4 = vld [vmem:[%s1402_s1 + $0x80] sm:$0xff]   ;;  %956 = vmatprep.mubr.msk.bf16.mxu1 %vm1134_vm1, %v1133_v3  ;;  %910 = vmatpush3.bf16.msra.mxu0 %v1025_v2  ;;  %v1029_v8 = vld [vmem:[%s1402_s1 + $0x88] sm:$0xff]   ;;  %v1032_v11 = vld [vmem:[%s1402_s1 + $0x90] sm:$0xff]   ;;  %s1052_s17 = scalar_lea.vmem %s1344_s11, 256  ;;  %s1056_s25 = sshll.u32 %s1136_s24, 4  ;;  %s1057_s25 = int_to_ptr.vmem [resolvable:$false] %s1056_s25 }
  0x21   : > { %1022 = vset.pattern.permute.xlu0 %v1135_v6  ;;  %941 = vmatpush3.bf16.msra.mxu1 %v1026_v4  ;;  %v1033_v12 = vld [vmem:[%s1402_s1 + $0x58] sm:$0xff]   ;;  %v1036_v15 = vld [vmem:[%s1402_s1 + $0x60] sm:$0xff]   ;;  %v1039_v18 = vld [vmem:[%s1402_s1 + $0x68] sm:$0xff]   ;;  %p1053_p13 = scmp.ne.s32.totalorder %s1344_s11, %s1052_s17  ;;  %s1058_s27 = scalar_lea.vmem %s1057_s25, 512 }
  0x22   : > { %1023 = vset.pattern.permute.xlu1 %v1135_v6  ;;  %911 = vmatprep.subr.bf16.mxu0 %v1027_v5  ;;  %v1034_v13 = vld [vmem:[%s1402_s1 + $0x18] sm:$0xff]   ;;  %v1037_v16 = vld [vmem:[%s1402_s1 + $0x20] sm:$0xff]   ;;  %v1040_v19 = vld [vmem:[%s1402_s1 + $0x28] sm:$0xff]   ;;  %p1059_p2 = scmp.lt.s32.totalorder %s1344_s11, %s1057_s25  ;;  %p1060_p3 = scmp.lt.s32.totalorder %s1058_s27, %s1052_s17 }
  0x23   : > { %942 = vmatprep.subr.bf16.mxu1 %v1133_v3  ;;  %v1035_v14 = vld [vmem:[%s1402_s1 + $0x98] sm:$0xff]   ;;  %v1038_v17 = vld [vmem:[%s1402_s1 + $0xa0] sm:$0xff]   ;;  %v1041_v20 = vld [vmem:[%s1402_s1 + $0xa8] sm:$0xff]   ;;  %p1054_p0 = pnand %p1053_p13, %p1209_p4 }
  0x24   : > { %912 = vmatpush3.bf16.msra.mxu0 %v1028_v7  ;;  %v1042_v21 = vld [vmem:[%s1402_s1 + $0x70] sm:$0xff]   ;;  %v1045_v24 = vld [vmem:[%s1402_s1 + $0x78] sm:$0xff]   ;;  %v650_v26 = vld [vmem:[%s1404_s3] sm:$0xff]  ;;  %p1061_p5 = por %p1060_p3, %p1059_p2 }
  0x25   : > { %943 = vmatpush3.bf16.msra.mxu1 %v1029_v8  ;;  %913 = vmatprep.subr.bf16.mxu0 %v1030_v9  ;;  %v1043_v22 = vld [vmem:[%s1402_s1 + $0x30] sm:$0xff]   ;;  %v664_v27 = vld [vmem:[%s1405_s4] sm:$0xff]  ;;  %v1046_v28 = vld [vmem:[%s1402_s1 + $0x38] sm:$0xff]   ;;  %p1055_p1 = pneg %p1054_p0 }
  0x26   : > { %944 = vmatprep.subr.bf16.mxu1 %v1133_v3  ;;  %v1044_v23 = vld [vmem:[%s1402_s1 + $0xb0] sm:$0xff]   ;;  %654 = vperm.xlu0 %1022, %v650_v26   ;;  %v1050_v29 = vld [vmem:[%s1402_s1 + $0xb8] sm:$0xff]   ;;  %v651_v30 = vld [vmem:[%s1404_s3 + $0x8] sm:$0xff] }
  0x27   : > { %v1049_v25 = vld [vmem:[%s1232_s13 + $0x4] ss:$12 sps:$4 sm:$0xff]   ;;  %668 = vperm.xlu1 %1023, %v664_v27   ;;  %v1047_v31 = vld [vmem:[%s1232_s13] ss:$12 sps:$4 sm:$0xff]   ;;  %v1051_v33 = vld [vmem:[%s1232_s13 + $0x8] ss:$12 sps:$4 sm:$0xff]   ;;  %p1062_p6 = pnand %p1061_p5, %p1055_p1 }
  0x28   : > { %914 = vmatpush3.bf16.msra.mxu0 %v1031_v10  ;;  %600 = vmatprep.mubr.bf16.mxu0 %v1049_v25  ;;  %v665_v32 = vld [vmem:[%s1405_s4 + $0x8] sm:$0xff]  ;;  %v873_v37 = vld [vmem:[%s1403_s2] ss:$0 sm:$0xff]  ;;  %s908_s13 = sshll.u32 %s1122_s21, 8  ;;  %s1353_s21 = scalar_lea.sflag [#allocation4], %s307_s7 }
  0x29   : > { %945 = vmatpush3.bf16.msra.mxu1 %v1032_v11  ;;  %915 = vmatprep.subr.bf16.mxu0 %v1033_v12  ;;  %v678_v52 = vld [vmem:[#allocation2] sm:$0xff]  ;;  %v679_v56 = vld [vmem:[#allocation2 + $0x8] sm:$0xff]  ;;  %s1342_s16 = scalar_lea.hbm %s1406_s5, %s908_s13 }
  0x2a   : > { %946 = vmatprep.subr.bf16.mxu1 %v1133_v3  ;;  %659 = vperm.xlu0 %1022, %v651_v30  }
  0x2b   : > { %673 = vperm.xlu1 %1023, %v665_v32  }
  0x2c   : > { %916 = vmatpush3.bf16.msra.mxu0 %v1034_v13 }
  0x2d   : > { %947 = vmatpush3.bf16.msra.mxu1 %v1035_v14  ;;  %917 = vmatprep.subr.bf16.mxu0 %v1036_v15 }
  0x2e   : > { %948 = vmatprep.subr.bf16.mxu1 %v1133_v3 }
  0x30   : > { %918 = vmatpush3.bf16.msra.mxu0 %v1037_v16 }
  0x31   : > { %949 = vmatpush3.bf16.msra.mxu1 %v1038_v17  ;;  %919 = vmatprep.subr.bf16.mxu0 %v1039_v18 }
  0x32   : > { %950 = vmatprep.subr.bf16.mxu1 %v1133_v3 }
  0x34   : > { %920 = vmatpush3.bf16.msra.mxu0 %v1040_v19 }
  0x35   : > { %951 = vmatpush3.bf16.msra.mxu1 %v1041_v20  ;;  %921 = vmatprep.subr.bf16.mxu0 %v1042_v21 }
  0x36   : > { %952 = vmatprep.subr.bf16.mxu1 %v1133_v3 }
  0x38   : > { %922 = vmatpush3.bf16.msra.mxu0 %v1043_v22 }
  0x39   : > { %953 = vmatpush3.bf16.msra.mxu1 %v1044_v23  ;;  %923 = vmatprep.subr.bf16.mxu0 %v1045_v24 }
  0x3a   : > { %954 = vmatprep.subr.bf16.mxu1 %v1133_v3 }
  0x3c   : > { %924 = vmatpush3.bf16.msra.mxu0 %v1046_v28 }
  0x3d   : > { %955 = vmatpush3.bf16.msra.mxu1 %v1050_v29 }
  0x3f   : > { %601 = vmatmul.mubr.bf16.vlgmr.msra.gmra.mrb[0].mxu0 %v1047_v31 }
  0x40   : > { %957 = vmatmul.mubr.bf16.vlgmr.msra.gmra.mrb[0].mxu1 %v1051_v33 }
  0xa5   : > { %v655_v35 = vpop.permute.xlu0 %654 }
  0xa6   : > { %v669_v47 = vpop.permute.xlu1 %668 }
  0xa9   : > { %v660_v53 = vpop.permute.xlu0 %659 }
  0xaa   : > { %v674_v57 = vpop.permute.xlu1 %673 }
 0x112   : > { %v925_v34 = vpop.f32.mrb[0].mxu0 }
 0x113   : > { %v926_v36 = vpop.f32.mrb[1].mxu0  ;;  %v643_v38 = vpop.f32.mrb[0].mxu1 }
 0x114   : > { %v927_v39 = vadd.f32 %v926_v36, %v925_v34  ;;  %v928_v40 = vpop.f32.mrb[2].mxu0  ;;  %v958_v41 = vpop.f32.mrb[1].mxu1 }
 0x115   : > { %v929_v42 = vpop.f32.mrb[3].mxu0  ;;  %v646_v43 = vpop.f32.mrb[2].mxu1 }
 0x116   : > { %v603_v44 = vadd.f32 %v927_v39, %v873_v37  ;;  %v930_v45 = vadd.f32 %v929_v42, %v928_v40  ;;  %v959_v46 = vpop.f32.mrb[3].mxu1 }
 0x118   : > { %v644_v48 = vadd.f32 %v643_v38, %v603_v44  ;;  %v606_v49 = vadd.f32 %v930_v45, %v873_v37 }
 0x11a   : > { %v662_v50 = vmul.f32 %v655_v35, %v644_v48  ;;  %v647_v51 = vadd.f32 %v646_v43, %v606_v49 }
 0x11c   : > { %v676_v54 = vadd.f32 %v669_v47, %v662_v50  ;;  %v663_v55 = vmul.f32 %v660_v53, %v647_v51 }
 0x11e   : > { %v680_v58 = vsub.f32 %v676_v54, %v678_v52  ;;  %v677_v59 = vadd.f32 %v674_v57, %v663_v55 }
 0x120   : > { %v682_v60 = vmul.f32 0.5, %v680_v58  ;;  %v681_v61 = vsub.f32 %v677_v59, %v679_v56 }
 0x122   : > { %v684_v62 = vadd.f32 %v682_v60, %v678_v52  ;;  %v683_v63 = vmul.f32 0.5, %v681_v61 }
 0x124   : > { %vm686_vm3 = vcmp.ge.f32.partialorder %v684_v62, 1.0  ;;  %v685_v0 = vadd.f32 %v683_v63, %v679_v56 }
 0x125   : > { %v901_v1 = vsel %vm686_vm3, 1.0, %v1133_v3 }
 0x126   : > { %v692_v2 = vsub.f32 1.0, %v901_v1  ;;  %699 = vst.msk [vmem:[%s1234_s14] sm:$0xff] %vm696_vm2, %v901_v1  ;;  %vm687_vm4 = vcmp.ge.f32.partialorder %v685_v0, 1.0 }
 0x127   : > { %v902_v4 = vsel %vm687_vm4, 1.0, %v1133_v3 }
 0x128   : > { %v694_v5 = vmul.f32 %v692_v2, %v684_v62  ;;  %v693_v6 = vsub.f32 1.0, %v902_v4  ;;  %700 = vst.msk [vmem:[%s1234_s14 + $0x8] sm:$0xff] %vm696_vm2, %v902_v4 }
 0x129   : > { %1065 = shalt.err (!%p1062_p6)
}
 0x12a   : > { %s1066_s7 = scalar_lea.hbm %s1342_s16, 256  ;;  %s1070_s8 = scalar_lea.hbm %s1406_s5, 1024 }
 0x12b   : > { %p1067_p7 = scmp.ne.s32.totalorder %s1342_s16, %s1066_s7  ;;  %p1071_p11 = scmp.lt.u32.totalorder %s1342_s16, %s1406_s5 }
 0x12c   : > { %p1072_p12 = scmp.lt.u32.totalorder %s1070_s8, %s1066_s7  ;;  %p1074_p0 = scmp.lt.u32.totalorder %s1066_s7, %s1342_s16 }
 0x12d   : > { %p1068_p9 = pnand %p1067_p7, %p1209_p4 }
 0x12e   : > { %p1073_p13 = por %p1072_p12, %p1071_p11 }
 0x12f   : > { %p1069_p10 = pneg %p1068_p9 }
 0x130   : > { %p1075_p1 = por %p1074_p0, %p1073_p13 }
 0x132   : > { %p1076_p2 = pnand %p1075_p1, %p1069_p10 }
 0x134   : > { %1079 = shalt.err (!%p1076_p2)
}
 0x135   : > { %s1137_s13 = smov 128   ;;  %s1138_s12 = smov 8   ;;  %697 = vst.msk [vmem:[#allocation2] sm:$0xff] %vm696_vm2, %v694_v5  ;;  %v695_v3 = vmul.f32 %v693_v6, %v685_v0 }
 0x136   : > { %961 = dma.vmem_to_hbm [thread:$0]  (%p1209_p4), %s1344_s11, 256, %s1342_s16, %s1353_s21, %s1137_s13, %s1137_s13, %s1138_s12  }
 0x137   : > { %698 = vst.msk [vmem:[#allocation2 + $0x8] sm:$0xff] %vm696_vm2, %v695_v3 }
 0x138 PF: > { %p967_p3 = scmp.ge.s32.totalorder %s1130_s23, 2  ;;  %s733_s15 = sand.u32 1, %s1110_s18  }
 0x139   : > { %s734_s17 = scalar_lea.sflag [#allocation4], %s733_s15 }
 0x13a   : > { %p964_p5 = pnand %p967_p3, %p1216_p8 }
 0x13c   : > { %1105 = dma.done.wait (!%p964_p5), %s734_s17, 256  }
 0x13d   : > { %1107 = vsyncadd (!%p964_p5), %s734_s17, 4294967040  ;;  %s18_s23 = sadd.s32 1, %s1130_s23   ;;  %s1409_s18 = smov %s1114_s19 }
 0x13e   : > { %p15_p6 = scmp.ge.s32.totalorder %s18_s23, 6   ;;  %s1410_s19 = smov %s1118_s20 }
 0x13f   : > { %s1411_s20 = smov %s1222_s6  ;;  %s1412_s21 = smov %s1126_s22 }
 0x140   : > { %s1413_s22 = smov %s1415_s26  ;;  %17 = sbr.rel (!%p15_p6) target bundleno = 4 (0x4), region = 91 }
 0x147   :  { %739 = vsyncpa [#allocation4], 1 }
 0x148   :  { %741 = vsyncpa [#allocation4 + $0x1], 1 }

</bundles_post_ra>
